<compile_context>
chip_gen: v7x
topology: tpu7x:2x2x1
jax: 0.10.0
libtpu: 0.0.40
codegen_flags: <defaults>
</compile_context>

<pallas_src>
import functools

import jax
import jax.numpy as jnp
from jax.experimental import pallas as pl
from jax.experimental.pallas import tpu as pltpu

LN_EPS = 1e-5  # PyTorch nn.LayerNorm default


def _round_up(n, m):
    return ((n + m - 1) // m) * m


def prenorm_linear_kernel(x_ref, w_ref, bias_ref, o_ref):
    """One (row_tile, n_tile) output tile: LayerNorm(x) rows, then xn @ W' + b'."""
    # LayerNorm statistics in f32 (biased variance, eps inside sqrt == PyTorch).
    x = x_ref[...].astype(jnp.float32)                        # (tm, D)
    mean = jnp.mean(x, axis=-1, keepdims=True)                # (tm, 1)
    xc = x - mean
    var = jnp.mean(xc * xc, axis=-1, keepdims=True)
    xn = xc * jax.lax.rsqrt(var + LN_EPS)                     # gamma/beta folded into W/bias
    # Matmul in the weight dtype (native MXU path for bf16 weights), f32 accumulation.
    y = jnp.dot(xn.astype(w_ref.dtype), w_ref[...],
                preferred_element_type=jnp.float32)           # (tm, tn)
    o_ref[...] = (y + bias_ref[...].astype(jnp.float32)).astype(o_ref.dtype)


@functools.partial(jax.jit, static_argnames=("row_tile", "n_tile"))
def prenorm(x, gamma, beta, w, bias, *, row_tile=256, n_tile=256):
    """PreNorm(dim, fn)(x) with fn = Linear(D, H).  x: (B, S, D) -> (B, S, H)."""
    B, S, D = x.shape
    H = w.shape[1]
    R = B * S

    # Fold the LayerNorm affine into the linear layer:
    #   (xn * gamma + beta) @ W + b  ==  xn @ (diag(gamma) @ W) + (beta @ W + b)
    wf = gamma.astype(jnp.float32)[:, None] * w.astype(jnp.float32)
    bf = beta.astype(jnp.float32) @ w.astype(jnp.float32) + bias.astype(jnp.float32)
    wf = wf.astype(w.dtype)

    # Row tile: large (MXU-friendly), but never bigger than the (padded) row count.
    tm = min(row_tile, _round_up(R, 8))
    Rp = _round_up(R, tm)
    # Lane-dense output: pad H to a multiple of 128 and tile it along a second grid axis.
    tn = min(n_tile, _round_up(H, 128))
    Hp = _round_up(H, tn)

    x2 = x.reshape(R, D)
    if Rp != R:
        # Zero rows normalize to zero rows (xc == 0), so padding is numerically safe.
        x2 = jnp.pad(x2, ((0, Rp - R), (0, 0)))
    if Hp != H:
        wf = jnp.pad(wf, ((0, 0), (0, Hp - H)))
        bf = jnp.pad(bf, ((0, Hp - H),))
    bf2 = bf.reshape(1, Hp)

    grid = (Rp // tm, Hp // tn)

    cost = pl.CostEstimate(
        flops=2 * R * D * H,
        transcendentals=0,
        bytes_accessed=(R * D + D * H + R * H) * x.dtype.itemsize,
    )

    out2 = pl.pallas_call(
        prenorm_linear_kernel,
        out_shape=jax.ShapeDtypeStruct((Rp, Hp), x.dtype),
        grid_spec=pltpu.PrefetchScalarGridSpec(
            num_scalar_prefetch=0,
            grid=grid,
            in_specs=[
                pl.BlockSpec((tm, D), lambda i, j: (i, 0)),   # x row tile
                pl.BlockSpec((D, tn), lambda i, j: (0, j)),   # W' column slab
                pl.BlockSpec((1, tn), lambda i, j: (0, j)),   # bias' slab
            ],
            out_specs=pl.BlockSpec((tm, tn), lambda i, j: (i, j)),
        ),
        compiler_params=pltpu.CompilerParams(
            dimension_semantics=("parallel", "parallel"),
            vmem_limit_bytes=48 * 1024 * 1024,
        ),
        cost_estimate=cost,
    )(x2, wf, bf2)

    return out2[:R, :H].reshape(B, S, H)


def _reference(x, gamma, beta, w, bias):
    xf = x.astype(jnp.float32)
    mean = jnp.mean(xf, axis=-1, keepdims=True)
    var = jnp.mean((xf - mean) ** 2, axis=-1, keepdims=True)
    xn = (xf - mean) * jax.lax.rsqrt(var + LN_EPS) * gamma.astype(jnp.float32) \
         + beta.astype(jnp.float32)
    return (xn @ w.astype(jnp.float32) + bias.astype(jnp.float32)).astype(x.dtype)


if __name__ == "__main__":
    key = jax.random.PRNGKey(0)
    B, S, D, H = 2, 8, 32, 64

    kx, kw, kb, kg, kbe = jax.random.split(key, 5)
    x = jax.random.normal(kx, (B, S, D), dtype=jnp.float32)

    # LayerNorm params: use non-trivial values so the gamma/beta fold is exercised.
    gamma = 1.0 + 0.1 * jax.random.normal(kg, (D,), dtype=jnp.float32)
    beta = 0.1 * jax.random.normal(kbe, (D,), dtype=jnp.float32)

    # fn = Linear(D, H); deterministic synthetic weights.
    w = jax.random.normal(kw, (D, H), dtype=jnp.float32) * (1.0 / D ** 0.5)
    bias = jax.random.normal(kb, (H,), dtype=jnp.float32) * 0.01

    out = prenorm(x, gamma, beta, w, bias)
    jax.block_until_ready(out)

    ref = _reference(x, gamma, beta, w, bias)
    assert out.shape == (B, S, H)
    # gamma/beta are folded into W/bias -> op order differs at the ~1 ulp level.
    assert jnp.allclose(out, ref, atol=1e-4, rtol=1e-4), "mismatch vs reference"

    print("KERNEL_OK")
</pallas_src>

<mosaic_0001>
module attributes {stable_mosaic.version = 11 : i64} {
  func.func @prenorm_linear_kernel(%arg0: i32, %arg1: i32, %arg2: memref<16x32xf32, #tpu.memory_space<vmem>>, %arg3: memref<32x128xf32, #tpu.memory_space<vmem>>, %arg4: memref<1x128xf32, #tpu.memory_space<vmem>>, %arg5: memref<16x128xf32, #tpu.memory_space<vmem>>) attributes {dimension_semantics = [#tpu.dimension_semantics<parallel>, #tpu.dimension_semantics<parallel>], iteration_bounds = array<i64: 1, 1>, scalar_prefetch = 0 : i64, scratch_operands = 0 : i64, tpu.core_type = #tpu.core_type<tc>, window_params = [{transform_indices = @transform_0, window_bounds = array<i64: 16, 32>}, {transform_indices = @transform_1, window_bounds = array<i64: 32, 128>}, {transform_indices = @transform_2, window_bounds = array<i64: 1, 128>}, {transform_indices = @transform_3, window_bounds = array<i64: 16, 128>}]} {
    %c0 = arith.constant 0 : index
    %c0_0 = arith.constant 0 : index
    %0 = vector.load %arg2[%c0, %c0_0] : memref<16x32xf32, #tpu.memory_space<vmem>>, vector<16x32xf32>
    %cst = arith.constant dense<0.000000e+00> : vector<16xf32>
    %1 = vector.multi_reduction <add>, %0, %cst [1] : vector<16x32xf32> to vector<16xf32>
    %2 = vector.shape_cast %1 : vector<16xf32> to vector<16x1xf32>
    %cst_1 = arith.constant 3.200000e+01 : f32
    %3 = vector.broadcast %cst_1 : f32 to vector<16x1xf32>
    %4 = arith.divf %2, %3 : vector<16x1xf32>
    %5 = vector.broadcast %4 : vector<16x1xf32> to vector<16x32xf32>
    %6 = arith.subf %0, %5 : vector<16x32xf32>
    %7 = arith.mulf %6, %6 : vector<16x32xf32>
    %cst_2 = arith.constant dense<0.000000e+00> : vector<16xf32>
    %8 = vector.multi_reduction <add>, %7, %cst_2 [1] : vector<16x32xf32> to vector<16xf32>
    %9 = vector.shape_cast %8 : vector<16xf32> to vector<16x1xf32>
    %cst_3 = arith.constant 3.200000e+01 : f32
    %10 = vector.broadcast %cst_3 : f32 to vector<16x1xf32>
    %11 = arith.divf %9, %10 : vector<16x1xf32>
    %cst_4 = arith.constant 9.99999974E-6 : f32
    %12 = vector.broadcast %cst_4 : f32 to vector<16x1xf32>
    %13 = arith.addf %11, %12 : vector<16x1xf32>
    %14 = math.rsqrt %13 : vector<16x1xf32>
    %15 = vector.broadcast %14 : vector<16x1xf32> to vector<16x32xf32>
    %16 = arith.mulf %6, %15 : vector<16x32xf32>
    %c0_5 = arith.constant 0 : index
    %c0_6 = arith.constant 0 : index
    %17 = vector.load %arg3[%c0_5, %c0_6] : memref<32x128xf32, #tpu.memory_space<vmem>>, vector<32x128xf32>
    %cst_7 = arith.constant dense<0.000000e+00> : vector<16x128xf32>
    %18 = tpu.matmul %16, %17, %cst_7 {dimension_numbers = #tpu.dot_dimension_numbers<[1], [0], [0], [1], [0, 0, 1, 1], [], []>} : vector<16x32xf32>, vector<32x128xf32>, vector<16x128xf32> -> vector<16x128xf32>
    %c0_8 = arith.constant 0 : index
    %c0_9 = arith.constant 0 : index
    %19 = vector.load %arg4[%c0_8, %c0_9] : memref<1x128xf32, #tpu.memory_space<vmem>>, vector<1x128xf32>
    %20 = vector.broadcast %19 : vector<1x128xf32> to vector<16x128xf32>
    %21 = arith.addf %18, %20 : vector<16x128xf32>
    %c0_10 = arith.constant 0 : index
    %c0_11 = arith.constant 0 : index
    %22 = vector.load %arg5[%c0_10, %c0_11] : memref<16x128xf32, #tpu.memory_space<vmem>>, vector<16x128xf32>
    tpu.vector_store %arg5[%c0_10, %c0_11], %21 {strides = array<i32>} : memref<16x128xf32, #tpu.memory_space<vmem>>, vector<16x128xf32>,
    return
  }
  func.func @transform_0(%arg0: i32, %arg1: i32) -> (i32, i32) {
    %c0_i32 = arith.constant 0 : i32
    %c0_i32_0 = arith.constant 0 : i32
    return %arg0, %c0_i32 : i32, i32
  }
  func.func @transform_1(%arg0: i32, %arg1: i32) -> (i32, i32) {
    %c0_i32 = arith.constant 0 : i32
    %c0_i32_0 = arith.constant 0 : i32
    return %c0_i32, %arg1 : i32, i32
  }
  func.func @transform_2(%arg0: i32, %arg1: i32) -> (i32, i32) {
    %c0_i32 = arith.constant 0 : i32
    %c0_i32_0 = arith.constant 0 : i32
    return %c0_i32, %arg1 : i32, i32
  }
  func.func @transform_3(%arg0: i32, %arg1: i32) -> (i32, i32) {
    %c0_i32 = arith.constant 0 : i32
    return %arg0, %arg1 : i32, i32
  }
}

</mosaic_0001>

<bundles_post_ra>
// kernel: prenorm.1
= control target key start
LH: loop header
LB: loop body
LE: loop exit
PB: predicated region body
PF: predicated region fallthrough
CT: control target
= control target key end

     0   :  { %vm16_vm0 = vcmask 261120   ;;  %s227_s0 = inlined_call_operand.vmem [shape: f32[16,32], index: 0, kind: input, shape index: {}]   ;;  %s228_s1 = inlined_call_operand.vmem [shape: f32[32,128], index: 1, kind: input, shape index: {}]   ;;  %s229_s2 = inlined_call_operand.vmem [shape: f32[1,128], index: 2, kind: input, shape index: {}]   ;;  %s230_s3 = inlined_call_operand.vmem [shape: f32[16,128], index: 3, kind: output, shape index: {}]  }
   0x1   :  { %v14_v0 = vld [vmem:[%s227_s0] sm:$0xff]  ;;  %v15_v1 = vld [vmem:[%s227_s0 + $0x8] sm:$0xff]  ;;  %v46_v16 = vld [vmem:[%s228_s1 + $0x10] sm:$0xff] }
   0x2   :  { %v17_v2 = vsel %vm16_vm0, %v14_v0, 0.0  ;;  %v20_v3 = vsel %vm16_vm0, %v15_v1, 0.0  ;;  %v44_v14 = vld [vmem:[%s228_s1] sm:$0xff]  ;;  %v45_v15 = vld [vmem:[%s228_s1 + $0x8] sm:$0xff]  ;;  %v47_v18 = vld [vmem:[%s228_s1 + $0x18] sm:$0xff] }
   0x3   :  { %18 = vadd.xlane.f32.xlu0 %v17_v2  ;;  %v162_v17 = vpack.c.bf16 %v45_v15, %v44_v14  ;;  %v166_v19 = vpack.c.bf16 %v47_v18, %v46_v16  ;;  %v142_v30 = vld [vmem:[%s229_s2] ss:$0 sm:$0xff] }
   0x5   :  { %163 = vmatprep.subr.bf16.mxu0 %v162_v17 }
   0x6   :  { %165 = vmatpush3.bf16.msra.mxu0 %v162_v17 }
   0x7   :  { %21 = vadd.xlane.f32.xlu0 %v20_v3  ;;  %167 = vmatprep.subr.bf16.mxu0 %v166_v19 }
   0xa   :  { %169 = vmatpush3.bf16.msra.mxu0 %v166_v19 }
  0x90   :  { %v19_v4 = vpop.xlane.xlu0 %18 }
  0x91   :  { %v24_v5 = vmul.f32 0.03125, %v19_v4 }
  0x93   :  { %v26_v6 = vsub.f32 %v14_v0, %v24_v5 }
  0x94   :  { %v22_v7 = vpop.xlane.xlu0 %21 }
  0x95   :  { %v25_v8 = vmul.f32 0.03125, %v22_v7  ;;  %v28_v9 = vmul.f32 %v26_v6, %v26_v6 }
  0x97   :  { %v27_v10 = vsub.f32 %v15_v1, %v25_v8  ;;  %v30_v11 = vsel %vm16_vm0, %v28_v9, 0.0 }
  0x98   :  { %31 = vadd.xlane.f32.xlu1 %v30_v11 }
  0x99   :  { %v29_v12 = vmul.f32 %v27_v10, %v27_v10 }
  0x9b   :  { %v33_v13 = vsel %vm16_vm0, %v29_v12, 0.0 }
  0x9c   :  { %34 = vadd.xlane.f32.xlu1 %v33_v13 }
 0x125   :  { %v32_v20 = vpop.xlane.xlu1 %31 }
 0x126   :  { %v36_v21 = vmul.f32 0.03125, %v32_v20 }
 0x128   :  { %v38_v22 = vadd.f32 1e-05, %v36_v21 }
 0x129   :  { %v35_v23 = vpop.xlane.xlu1 %34 }
 0x12a   :  { %170 = vrsqrt.f32 %v38_v22  ;;  %v37_v24 = vmul.f32 0.03125, %v35_v23 }
 0x12c   :  { %v39_v25 = vadd.f32 1e-05, %v37_v24 }
 0x12e   :  { %172 = vrsqrt.f32 %v39_v25 }
 0x134   :  { %v171_v26 = vpop.eup %170 }
 0x135   :  { %v42_v27 = vmul.f32 %v171_v26, %v26_v6 }
 0x137   :  { %159 = vmatprep.mubr.msk.f32.mxu0 %vm16_vm0, %v42_v27 }
 0x138   :  { %v173_v28 = vpop.eup %172 }
 0x139   :  { %v43_v29 = vmul.f32 %v173_v28, %v27_v10 }
 0x13b   :  { %160 = vmatmul.mubr.msk.f32.vlgmr.msra.gmra.mrb[0].mxu0 %vm16_vm0, %v43_v29 }
 0x20e   :  { %v161_v31 = vpop.f32.mrb[0].mxu0 }
 0x20f   :  { %v133_v32 = vadd.f32 %v161_v31, %v142_v30  ;;  %v127_v33 = vpop.f32.mrb[1].mxu0 }
 0x210   :  { %v128_v34 = vadd.f32 %v142_v30, %v127_v33 }
 0x211   :  { %137 = vst [vmem:[%s230_s3 + $0x8] sm:$0xff] %v133_v32 }
 0x212   :  { %136 = vst [vmem:[%s230_s3] sm:$0xff] %v128_v34 }

</bundles_post_ra>
